<compile_context>
chip_gen: v7x
topology: tpu7x:2x2x1
jax: 0.10.0
libtpu: 0.0.40
codegen_flags: <defaults>
</compile_context>

<pallas_src>
import functools

import jax
import jax.numpy as jnp
from jax.experimental import pallas as pl
from jax.experimental.pallas import tpu as pltpu


# ----------------------------- Pallas kernel ------------------------------ #
def _vamps_kernel(s_kernel_ref, chi_t_ref, chi_tau_ref, u_ref, v_ref,
                  rhs_cat_ref, c11_ref,
                  vamp_e_ref, k_ref, probs_ref, s_ref, *, n_batch):
    f32 = jnp.float32
    M = s_kernel_ref.shape[0]

    # MXU matmul with standard contraction (lhs dim 1 x rhs dim 0), f32 acc.
    dot = lambda a, b: jax.lax.dot_general(
        a, b, (((1,), (0,)), ((), ())), preferred_element_type=f32)

    # kernel_w = activation(s_kernel); w1 = kernel_w + kernel_w.T (symmetric)
    kernel_w = jnp.exp(s_kernel_ref[...])                     # (M, M)
    w1 = kernel_w + kernel_w.T                                # (M, M), symmetric

    v = v_ref[...]                                            # (M, 1)
    w_norm = dot(w1, v)                                       # (M, 1)
    # TODO(synk): renorm branch (divide w1 by max|w_norm|) not implemented (renorm=False).

    # S = w1 + diag((1 - w_norm) / v)   -- still symmetric, so S.T == S.
    w2 = (1.0 - w_norm) / v                                   # (M, 1)
    row = jax.lax.broadcasted_iota(jnp.int32, (M, M), 0)
    col = jax.lax.broadcasted_iota(jnp.int32, (M, M), 1)
    S = w1 + jnp.where(row == col, w2, jnp.zeros((), f32))    # (M, M)

    # probs = sum(chi_t * norm * (chi_tau @ S) * (chi_tau . u), axis=1)
    #   (S @ chi_tau.T).T == chi_tau @ S because S is symmetric.
    chi_t = chi_t_ref[...]                                    # (B, M)
    chi_tau = chi_tau_ref[...]                                # (B, M)
    u = u_ref[...]                                            # (1, M)
    norm = jnp.asarray(1.0 / n_batch, f32)
    u_dot = jnp.sum(chi_tau * u, axis=1, keepdims=True)       # (B, 1)  VPU path
    q = norm * dot(chi_tau, S) * u_dot                        # (B, M)
    probs_ref[...] = jnp.sum(chi_t * q, axis=1)[None, :]      # (1, B) lane-dense

    # Fused MXU call: S @ [C00 | C01 | sigma]  (one (M,M)x(M,3M) matmul).
    P = dot(S, rhs_cat_ref[...])                              # (M, 3M)
    S_C00 = P[:, :M]                                          # S.T @ C00  (S sym)
    S_C01 = P[:, M:2 * M]                                     # S.T @ C01
    K = P[:, 2 * M:3 * M]                                     # S @ sigma

    # vamp_e = S.T @ C00 @ S @ C11 - 2 * S.T @ C01
    vamp_e = dot(dot(S_C00, S), c11_ref[...]) - 2.0 * S_C01   # (M, M)

    vamp_e_ref[...] = vamp_e
    k_ref[...] = K
    s_ref[...] = S


# ------------------------------ JAX wrapper -------------------------------- #
def vamps_forward(s_kernel, chi_t, chi_tau, u, v, C00, C11, C01, sigma):
    """Equivalent of VAMPS.forward([chi_t, chi_tau, u, v, C00, C11, C01, sigma])."""
    n_batch, M = chi_t.shape

    # Glue (fused by XLA with adjacent ops): the PyTorch module slices [0] out
    # of the batched/tiled operands. Concatenate the three shared-LHS RHS
    # matrices once, outside the kernel.
    u0 = u[0]                                                 # (1, M)
    v0 = v[0]                                                 # (M, 1)
    c11_0 = C11[0]                                            # (M, M)
    rhs_cat = jnp.concatenate([C00[0], C01[0], sigma[0]], axis=1)  # (M, 3M)

    vmem = pl.BlockSpec(memory_space=pltpu.MemorySpace.VMEM)
    out_shape = (
        jax.ShapeDtypeStruct((M, M), jnp.float32),            # vamp_e
        jax.ShapeDtypeStruct((M, M), jnp.float32),            # K
        jax.ShapeDtypeStruct((1, n_batch), jnp.float32),      # probs (lane-dense)
        jax.ShapeDtypeStruct((M, M), jnp.float32),            # S
    )
    vamp_e, K, probs2d, S = pl.pallas_call(
        functools.partial(_vamps_kernel, n_batch=n_batch),
        out_shape=out_shape,
        in_specs=[vmem] * 7,
        out_specs=(vmem, vmem, vmem, vmem),
    )(s_kernel, chi_t, chi_tau, u0, v0, rhs_cat, c11_0)

    probs = probs2d[0]                                        # (n_batch,)
    # Lazy B-fold tiling (matches torch.tile semantics without kernel writeback).
    tile = lambda a: jnp.broadcast_to(a[None], (n_batch, M, M))
    return [tile(vamp_e), tile(K), probs, tile(S)]
    # TODO(synk): the single-tensor path (x * activation(s_kernel).view(1,-1)) and
    # the 5-input path (probs = zeros) are not covered by this kernel.


# --------------------------- pure-JAX reference ---------------------------- #
def vamps_reference(s_kernel, chi_t, chi_tau, u, v, C00, C11, C01, sigma):
    n_batch, M = chi_t.shape
    u0, v0 = u[0], v[0]
    c00_0, c11_0, c01_0, sigma0 = C00[0], C11[0], C01[0], sigma[0]
    kernel_w = jnp.exp(s_kernel)
    w1 = kernel_w + kernel_w.T
    w_norm = w1 @ v0
    w2 = (1.0 - jnp.squeeze(w_norm)) / jnp.squeeze(v0)
    S = w1 + jnp.diag(w2)
    norm = 1.0 / n_batch
    q = norm * (S @ chi_tau.T).T * (chi_tau @ u0.T)
    probs = jnp.sum(chi_t * q, axis=1)
    K = S @ sigma0
    vamp_e = S.T @ c00_0 @ S @ c11_0 - 2.0 * S.T @ c01_0
    tile = lambda a: jnp.broadcast_to(a[None], (n_batch, M, M))
    return [tile(vamp_e), tile(K), probs, tile(S)]


# ---------------------------------- main ----------------------------------- #
if __name__ == "__main__":
    B, M = 8, 32  # n_batch, units

    # deterministic parameter init (matches 0.1 * torch.ones((M, M)))
    s_kernel = 0.1 * jnp.ones((M, M), jnp.float32)

    key = jax.random.PRNGKey(0)
    k = jax.random.split(key, 8)
    chi_t = jax.nn.softmax(jax.random.normal(k[0], (B, M)), axis=-1).astype(jnp.float32)
    chi_tau = jax.nn.softmax(jax.random.normal(k[1], (B, M)), axis=-1).astype(jnp.float32)
    # tiled (identical-per-batch) operands, like the PyTorch callers produce
    u = jnp.broadcast_to(jnp.abs(jax.random.normal(k[2], (1, 1, M))) + 0.5, (B, 1, M)).astype(jnp.float32)
    v = jnp.broadcast_to(jnp.abs(jax.random.normal(k[3], (1, M, 1))) + 0.5, (B, M, 1)).astype(jnp.float32)
    C00 = jnp.broadcast_to(jax.random.normal(k[4], (1, M, M)), (B, M, M)).astype(jnp.float32)
    C11 = jnp.broadcast_to(jax.random.normal(k[5], (1, M, M)), (B, M, M)).astype(jnp.float32)
    C01 = jnp.broadcast_to(jax.random.normal(k[6], (1, M, M)), (B, M, M)).astype(jnp.float32)
    sigma = jnp.broadcast_to(jax.random.normal(k[7], (1, M, M)), (B, M, M)).astype(jnp.float32)

    out = vamps_forward(s_kernel, chi_t, chi_tau, u, v, C00, C11, C01, sigma)
    out = jax.block_until_ready(out)

    ref = vamps_reference(s_kernel, chi_t, chi_tau, u, v, C00, C11, C01, sigma)
    for got, want in zip(out, ref):
        assert got.shape == want.shape, (got.shape, want.shape)
        assert jnp.allclose(got, want, rtol=1e-4, atol=1e-4), \
            float(jnp.max(jnp.abs(got - want)))

    print("KERNEL_OK")
</pallas_src>

<mosaic_0001>
module attributes {stable_mosaic.version = 11 : i64} {
  func.func @_vamps_kernel(%arg0: memref<32x32xf32, #tpu.memory_space<vmem>>, %arg1: memref<8x32xf32, #tpu.memory_space<vmem>>, %arg2: memref<8x32xf32, #tpu.memory_space<vmem>>, %arg3: memref<1x32xf32, #tpu.memory_space<vmem>>, %arg4: memref<32x1xf32, #tpu.memory_space<vmem>>, %arg5: memref<32x96xf32, #tpu.memory_space<vmem>>, %arg6: memref<32x32xf32, #tpu.memory_space<vmem>>, %arg7: memref<32x32xf32, #tpu.memory_space<vmem>>, %arg8: memref<32x32xf32, #tpu.memory_space<vmem>>, %arg9: memref<1x8xf32, #tpu.memory_space<vmem>>, %arg10: memref<32x32xf32, #tpu.memory_space<vmem>>) attributes {dimension_semantics = [], scalar_prefetch = 0 : i64, scratch_operands = 0 : i64, tpu.core_type = #tpu.core_type<tc>} {
    %c0 = arith.constant 0 : index
    %c0_0 = arith.constant 0 : index
    %0 = vector.load %arg0[%c0, %c0_0] : memref<32x32xf32, #tpu.memory_space<vmem>>, vector<32x32xf32>
    %1 = math.exp %0 : vector<32x32xf32>
    %2 = tpu.transpose %1, [1, 0] : vector<32x32xf32> -> vector<32x32xf32>
    %3 = arith.addf %1, %2 : vector<32x32xf32>
    %c0_1 = arith.constant 0 : index
    %c0_2 = arith.constant 0 : index
    %4 = vector.load %arg4[%c0_1, %c0_2] : memref<32x1xf32, #tpu.memory_space<vmem>>, vector<32x1xf32>
    %cst = arith.constant dense<0.000000e+00> : vector<32x1xf32>
    %5 = tpu.matmul %3, %4, %cst {dimension_numbers = #tpu.dot_dimension_numbers<[1], [0], [0], [1], [0, 0, 1, 1], [], []>} : vector<32x32xf32>, vector<32x1xf32>, vector<32x1xf32> -> vector<32x1xf32>
    %cst_3 = arith.constant 1.000000e+00 : f32
    %6 = vector.broadcast %cst_3 : f32 to vector<32x1xf32>
    %7 = arith.subf %6, %5 : vector<32x1xf32>
    %8 = arith.divf %7, %4 : vector<32x1xf32>
    %9 = tpu.iota {dimensions = array<i32: 0>} : vector<32x32xi32>
    %10 = tpu.iota {dimensions = array<i32: 1>} : vector<32x32xi32>
    %11 = arith.cmpi eq, %9, %10 : vector<32x32xi32>
    %cst_4 = arith.constant 0.000000e+00 : f32
    %12 = vector.shape_cast %8 : vector<32x1xf32> to vector<32x1xf32>
    %13 = vector.broadcast %12 : vector<32x1xf32> to vector<32x32xf32>
    %14 = vector.broadcast %cst_4 : f32 to vector<32x32xf32>
    %15 = arith.select %11, %13, %14 : vector<32x32xi1>, vector<32x32xf32>
    %16 = arith.addf %3, %15 : vector<32x32xf32>
    %c0_5 = arith.constant 0 : index
    %c0_6 = arith.constant 0 : index
    %17 = vector.load %arg1[%c0_5, %c0_6] : memref<8x32xf32, #tpu.memory_space<vmem>>, vector<8x32xf32>
    %c0_7 = arith.constant 0 : index
    %c0_8 = arith.constant 0 : index
    %18 = vector.load %arg2[%c0_7, %c0_8] : memref<8x32xf32, #tpu.memory_space<vmem>>, vector<8x32xf32>
    %c0_9 = arith.constant 0 : index
    %c0_10 = arith.constant 0 : index
    %19 = vector.load %arg3[%c0_9, %c0_10] : memref<1x32xf32, #tpu.memory_space<vmem>>, vector<1x32xf32>
    %20 = vector.broadcast %19 : vector<1x32xf32> to vector<8x32xf32>
    %21 = arith.mulf %18, %20 : vector<8x32xf32>
    %cst_11 = arith.constant dense<0.000000e+00> : vector<8xf32>
    %22 = vector.multi_reduction <add>, %21, %cst_11 [1] : vector<8x32xf32> to vector<8xf32>
    %23 = vector.shape_cast %22 : vector<8xf32> to vector<8x1xf32>
    %cst_12 = arith.constant dense<0.000000e+00> : vector<8x32xf32>
    %24 = tpu.matmul %18, %16, %cst_12 {dimension_numbers = #tpu.dot_dimension_numbers<[1], [0], [0], [1], [0, 0, 1, 1], [], []>} : vector<8x32xf32>, vector<32x32xf32>, vector<8x32xf32> -> vector<8x32xf32>
    %cst_13 = arith.constant 1.250000e-01 : f32
    %25 = vector.broadcast %cst_13 : f32 to vector<8x32xf32>
    %26 = arith.mulf %25, %24 : vector<8x32xf32>
    %27 = vector.broadcast %23 : vector<8x1xf32> to vector<8x32xf32>
    %28 = arith.mulf %26, %27 : vector<8x32xf32>
    %29 = arith.mulf %17, %28 : vector<8x32xf32>
    %cst_14 = arith.constant dense<0.000000e+00> : vector<8xf32>
    %30 = vector.multi_reduction <add>, %29, %cst_14 [1] : vector<8x32xf32> to vector<8xf32>
    %31 = vector.shape_cast %30 : vector<8xf32> to vector<1x8xf32>
    %c0_15 = arith.constant 0 : index
    %c0_16 = arith.constant 0 : index
    %32 = vector.load %arg9[%c0_15, %c0_16] : memref<1x8xf32, #tpu.memory_space<vmem>>, vector<1x8xf32>
    tpu.vector_store %arg9[%c0_15, %c0_16], %31 {strides = array<i32>} : memref<1x8xf32, #tpu.memory_space<vmem>>, vector<1x8xf32>,
    %c0_17 = arith.constant 0 : index
    %c0_18 = arith.constant 0 : index
    %33 = vector.load %arg5[%c0_17, %c0_18] : memref<32x96xf32, #tpu.memory_space<vmem>>, vector<32x96xf32>
    %cst_19 = arith.constant dense<0.000000e+00> : vector<32x96xf32>
    %34 = tpu.matmul %16, %33, %cst_19 {dimension_numbers = #tpu.dot_dimension_numbers<[1], [0], [0], [1], [0, 0, 1, 1], [], []>} : vector<32x32xf32>, vector<32x96xf32>, vector<32x96xf32> -> vector<32x96xf32>
    %35 = vector.extract_strided_slice %34 {offsets = [0, 0], sizes = [32, 32], strides = [1, 1]} : vector<32x96xf32> to vector<32x32xf32>
    %36 = vector.extract_strided_slice %34 {offsets = [0, 32], sizes = [32, 32], strides = [1, 1]} : vector<32x96xf32> to vector<32x32xf32>
    %37 = vector.extract_strided_slice %34 {offsets = [0, 64], sizes = [32, 32], strides = [1, 1]} : vector<32x96xf32> to vector<32x32xf32>
    %cst_20 = arith.constant dense<0.000000e+00> : vector<32x32xf32>
    %38 = tpu.matmul %35, %16, %cst_20 {dimension_numbers = #tpu.dot_dimension_numbers<[1], [0], [0], [1], [0, 0, 1, 1], [], []>} : vector<32x32xf32>, vector<32x32xf32>, vector<32x32xf32> -> vector<32x32xf32>
    %c0_21 = arith.constant 0 : index
    %c0_22 = arith.constant 0 : index
    %39 = vector.load %arg6[%c0_21, %c0_22] : memref<32x32xf32, #tpu.memory_space<vmem>>, vector<32x32xf32>
    %cst_23 = arith.constant dense<0.000000e+00> : vector<32x32xf32>
    %40 = tpu.matmul %38, %39, %cst_23 {dimension_numbers = #tpu.dot_dimension_numbers<[1], [0], [0], [1], [0, 0, 1, 1], [], []>} : vector<32x32xf32>, vector<32x32xf32>, vector<32x32xf32> -> vector<32x32xf32>
    %cst_24 = arith.constant 2.000000e+00 : f32
    %41 = vector.broadcast %cst_24 : f32 to vector<32x32xf32>
    %42 = arith.mulf %41, %36 : vector<32x32xf32>
    %43 = arith.subf %40, %42 : vector<32x32xf32>
    %c0_25 = arith.constant 0 : index
    %c0_26 = arith.constant 0 : index
    %44 = vector.load %arg7[%c0_25, %c0_26] : memref<32x32xf32, #tpu.memory_space<vmem>>, vector<32x32xf32>
    tpu.vector_store %arg7[%c0_25, %c0_26], %43 {strides = array<i32>} : memref<32x32xf32, #tpu.memory_space<vmem>>, vector<32x32xf32>,
    %c0_27 = arith.constant 0 : index
    %c0_28 = arith.constant 0 : index
    %45 = vector.load %arg8[%c0_27, %c0_28] : memref<32x32xf32, #tpu.memory_space<vmem>>, vector<32x32xf32>
    tpu.vector_store %arg8[%c0_27, %c0_28], %37 {strides = array<i32>} : memref<32x32xf32, #tpu.memory_space<vmem>>, vector<32x32xf32>,
    %c0_29 = arith.constant 0 : index
    %c0_30 = arith.constant 0 : index
    %46 = vector.load %arg10[%c0_29, %c0_30] : memref<32x32xf32, #tpu.memory_space<vmem>>, vector<32x32xf32>
    tpu.vector_store %arg10[%c0_29, %c0_30], %16 {strides = array<i32>} : memref<32x32xf32, #tpu.memory_space<vmem>>, vector<32x32xf32>,
    return
  }
}

</mosaic_0001>

<bundles_post_ra>
// kernel: tpu_custom_call.1
= control target key start
LH: loop header
LB: loop body
LE: loop exit
PB: predicated region body
PF: predicated region fallthrough
CT: control target
= control target key end

     0   :  { %16 = vsyncpa [#allocation3], 0  ;;  %s1412_s0 = inlined_call_operand.vmem [shape: f32[32,32], index: 0, kind: input, shape index: {}]   ;;  %s1413_s1 = inlined_call_operand.hbm [shape: f32[8,32], index: 1, kind: input, shape index: {}]   ;;  %s1414_s2 = inlined_call_operand.vmem [shape: f32[8,32], index: 2, kind: input, shape index: {}]   ;;  %s1415_s3 = inlined_call_operand.vmem [shape: f32[1,32], index: 3, kind: input, shape index: {}]   ;;  %s1416_s4 = inlined_call_operand.vmem [shape: f32[32,1], index: 4, kind: input, shape index: {}]   ;;  %s1417_s5 = inlined_call_operand.hbm [shape: f32[32,96], index: 5, kind: input, shape index: {}]   ;;  %s1418_s6 = inlined_call_operand.hbm [shape: f32[32,32], index: 6, kind: input, shape index: {}]   ;;  %s1419_s7 = inlined_call_operand.hbm [shape: f32[32,32], index: 7, kind: output, shape index: {0}]   ;;  %s1420_s8 = inlined_call_operand.hbm [shape: f32[32,32], index: 8, kind: output, shape index: {1}]   ;;  %s1421_s9 = inlined_call_operand.hbm [shape: f32[1,8], index: 9, kind: output, shape index: {2}]   ;;  %s1422_s10 = inlined_call_operand.hbm [shape: f32[32,32], index: 10, kind: output, shape index: {3}]  }
   0x1   :  { %17 = vsyncpa [#allocation6], 0 }
   0x2   :  { %18 = vsyncpa [#allocation4], 0 }
   0x3   :  { %19 = vsyncpa [#allocation10], 0 }
   0x4   :  { %20 = vsyncpa [#allocation13], 0  ;;  %s1144_s13 = smov [#allocation5]   ;;  %s980_s17 = scalar_lea.hbm %s1417_s5, 512 }
   0x5   :  { %s44_s14 = sshll.u32 %s1144_s13, 4  ;;  %p981_p0 = scmp.ne.s32.totalorder %s1417_s5, %s980_s17  ;;  %s45_s14 = int_to_ptr.vmem [resolvable:$true] %s44_s14 }
   0x6   :  { %p984_p1 = scmp.lt.u32.totalorder %s980_s17, %s1417_s5 }
   0x8   :  { %p986_p2 = pnand %p984_p1, %p981_p0 }
   0xa   :  { %989 = shalt.err (!%p986_p2)
}
   0xb   :  { %s990_s22 = scalar_lea.vmem %s45_s14, 512  ;;  %p995_p4 = scmp.lt.s32.totalorder %s45_s14, %s45_s14 }
   0xc   :  { %p991_p3 = scmp.ne.s32.totalorder %s45_s14, %s990_s22  ;;  %p996_p5 = scmp.lt.s32.totalorder %s990_s22, %s990_s22 }
   0xe   :  { %p997_p6 = por %p996_p5, %p995_p4 }
  0x10   :  { %p998_p7 = pnand %p997_p6, %p991_p3 }
  0x12   :  { %1001 = shalt.err (!%p998_p7)
}
  0x13   :  { %s1145_s23 = smov 128   ;;  %s1146_s24 = smov 8  }
  0x14   :  { %50 = dma.hbm_to_vmem [thread:$0]  %s1417_s5, 512, %s45_s14, [#allocation6], %s1145_s23, %s1145_s23, %s1146_s24  }
  0x15   :  { %s1147_s27 = smov [#allocation2]   ;;  %s1148_s29 = smov [#allocation7]  }
  0x16   :  { %s29_s28 = sshll.u32 %s1147_s27, 4  ;;  %s56_s30 = sshll.u32 %s1148_s29, 4  ;;  %s30_s28 = int_to_ptr.vmem [resolvable:$true] %s29_s28  ;;  %s57_s30 = int_to_ptr.vmem [resolvable:$true] %s56_s30 }
  0x17   :  { %s1002_s13 = scalar_lea.hbm %s1413_s1, 128 }
  0x18   :  { %p1003_p8 = scmp.ne.s32.totalorder %s1413_s1, %s1002_s13  ;;  %p1006_p9 = scmp.lt.u32.totalorder %s1002_s13, %s1413_s1 }
  0x1a   :  { %p1008_p10 = pnand %p1006_p9, %p1003_p8 }
  0x1c   :  { %1011 = shalt.err (!%p1008_p10)
}
  0x1d   :  { %s1012_s5 = scalar_lea.vmem %s30_s28, 128  ;;  %p1017_p12 = scmp.lt.s32.totalorder %s30_s28, %s30_s28 }
  0x1e   :  { %p1013_p11 = scmp.ne.s32.totalorder %s30_s28, %s1012_s5  ;;  %p1018_p13 = scmp.lt.s32.totalorder %s1012_s5, %s1012_s5 }
  0x20   :  { %p1019_p0 = por %p1018_p13, %p1017_p12 }
  0x22   :  { %p1020_p1 = pnand %p1019_p0, %p1013_p11 }
  0x24   :  { %1023 = shalt.err (!%p1020_p1)
}
  0x25   :  { %32 = dma.hbm_to_vmem [thread:$0]  %s1413_s1, 128, %s30_s28, [#allocation3]  }
  0x26   :  { %s1024_s22 = scalar_lea.hbm %s1418_s6, 512 }
  0x27   :  { %p1025_p2 = scmp.ne.s32.totalorder %s1418_s6, %s1024_s22  ;;  %p1028_p3 = scmp.lt.u32.totalorder %s1024_s22, %s1418_s6 }
  0x29   :  { %p1030_p4 = pnand %p1028_p3, %p1025_p2 }
  0x2b   :  { %1033 = shalt.err (!%p1030_p4)
}
  0x2c   :  { %s1034_s11 = scalar_lea.vmem %s57_s30, 512  ;;  %p1039_p6 = scmp.lt.s32.totalorder %s57_s30, %s57_s30 }
  0x2d   :  { %p1035_p5 = scmp.ne.s32.totalorder %s57_s30, %s1034_s11  ;;  %p1040_p7 = scmp.lt.s32.totalorder %s1034_s11, %s1034_s11 }
  0x2f   :  { %p1041_p8 = por %p1040_p7, %p1039_p6 }
  0x31   :  { %p1042_p9 = pnand %p1041_p8, %p1035_p5 }
  0x33   :  { %1045 = shalt.err (!%p1042_p9)
}
  0x34   :  { %62 = dma.hbm_to_vmem [thread:$0]  %s1418_s6, 512, %s57_s30, [#allocation6], %s1145_s23, %s1145_s23, %s1146_s24  }
  0x35   :  { %1134 = dma.done.wait [#allocation3], 128  }
  0x36   :  { %1135 = vsyncadd [#allocation3], 4294967168 }
  0x37   :  { %1136 = dma.done.wait [#allocation6], 1024  }
  0x38   :  { %1137 = vsyncadd [#allocation6], 4294966272  ;;  %v72_v0 = vld [vmem:[%s1412_s0] sm:$0xff]  ;;  %v73_v1 = vld [vmem:[%s1412_s0 + $0x8] sm:$0xff]  ;;  %vm124_vm0 = vcmask 261120   ;;  %v1149_v26 = vmov 0   ;;  %v234_v55 = vlaneseq }
  0x39   :  { %v76_v2 = vmul.f32 1.442695, %v72_v0  ;;  %v78_v3 = vmul.f32 1.442695, %v73_v1  ;;  %v74_v4 = vld [vmem:[%s1412_s0 + $0x10] sm:$0xff]  ;;  %v120_v5 = vld [vmem:[%s1416_s4] sm:$0xff]  ;;  %962 = vset.pattern.permute.xlu1 %v1149_v26 }
  0x3a   :  { %v121_v6 = vld [vmem:[%s1416_s4 + $0x8] sm:$0xff]  ;;  %v80_v8 = vmul.f32 1.442695, %v74_v4  ;;  %v75_v9 = vld [vmem:[%s1412_s0 + $0x18] sm:$0xff]  ;;  %v122_v12 = vld [vmem:[%s1416_s4 + $0x10] sm:$0xff]  ;;  %v1150_v49 = vmov 0.0|0.0  }
  0x3b   :  { %964 = vpow2.f32 %v76_v2  ;;  %v905_v7 = vpack.c.bf16 %v121_v6, %v120_v5  ;;  %v82_v10 = vmul.f32 1.442695, %v75_v9  ;;  %v123_v13 = vld [vmem:[%s1416_s4 + $0x18] sm:$0xff]  ;;  %v373_v33 = vld [vmem:[#allocation5] sm:$0xff]  ;;  %v374_v34 = vld [vmem:[#allocation5 + $0x8] sm:$0xff]  ;;  %913 = vmatprep.subr.bf16.mxu1 %v1150_v49  ;;  %vm1151_vm1 = vmmov 0  }
  0x3c   :  { %966 = vpow2.f32 %v78_v3  ;;  %v909_v15 = vpack.c.bf16 %v123_v13, %v122_v12  ;;  %v919_v36 = vpack.c.bf16 %v374_v34, %v373_v33  ;;  %v375_v38 = vld [vmem:[#allocation5 + $0x10] sm:$0xff]  ;;  %v376_v39 = vld [vmem:[#allocation5 + $0x18] sm:$0xff]  ;;  %v1152_v50 = vmov 0.0   ;;  %s1155_s11 = smov [#allocation9]  }
  0x3d   :  { %906 = vmatprep.subr.bf16.mxu0 %v905_v7  ;;  %968 = vpow2.f32 %v80_v8  ;;  %v923_v40 = vpack.c.bf16 %v376_v39, %v375_v38  ;;  %860 = vmatprep.mubr.msk.f32.mxu1 %vm1151_vm1, %v1152_v50  ;;  %v274_v51 = vld [vmem:[%s1414_s2] sm:$0xff]  ;;  %v1300_v56 = vshrl.u32 %v234_v55, 7  ;;  %v1303_v58 = vand.u32 127, %v234_v55  ;;  %s1153_s2 = smov 64   ;;  %s737_s1 = sshll.u32 %s1155_s11, 4  ;;  %s738_s1 = int_to_ptr.vmem [resolvable:$true] %s737_s1 }
  0x3e   :  { %908 = vmatpush3.bf16.msra.mxu0 %v905_v7  ;;  %970 = vpow2.f32 %v82_v10  ;;  %v787_v52 = vld [vmem:[%s1415_s3] ss:$0 sm:$0xff]  ;;  %s1154_s3 = smov 96   ;;  %vm371_vm6 = vcmask 57344   ;;  %s1046_s28 = scalar_lea.vmem %s738_s1, 512 }
  0x3f   :  { %910 = vmatprep.subr.bf16.mxu0 %v909_v15  ;;  %972 = vrcp.f32 %v121_v6  ;;  %v282_v53 = vmul.f32 %v787_v52, %v274_v51  ;;  %v236_v57 = vadd.s32 8, %v1300_v56  ;;  %vm241_vm3 = vcmp.eq.s32.totalorder %v1300_v56, %v1303_v58  ;;  %p1047_p10 = scmp.ne.s32.totalorder %s738_s1, %s1046_s28  ;;  %p1051_p11 = scmp.lt.s32.totalorder %s738_s1, %s738_s1 }
  0x40   :  { %974 = vrcp.f32 %v120_v5  ;;  %v237_v62 = vadd.s32 16, %v1300_v56  ;;  %v238_v2 = vadd.s32 24, %v1300_v56  ;;  %p1052_p12 = scmp.lt.s32.totalorder %s1046_s28, %s1046_s28 }
  0x41   :  { %976 = vrcp.f32 %v123_v13  ;;  %v283_v54 = vsel %vm124_vm0, %v282_v53, 0.0  ;;  %vm242_vm2 = vcmp.eq.s32.totalorder %v236_v57, %v1303_v58 }
  0x42   :  { %912 = vmatpush3.bf16.msra.mxu0 %v909_v15  ;;  %978 = vrcp.f32 %v122_v12  ;;  %vm243_vm4 = vcmp.eq.s32.totalorder %v237_v62, %v1303_v58  ;;  %vm244_vm5 = vcmp.eq.s32.totalorder %v238_v2, %v1303_v58  ;;  %p1053_p13 = por %p1052_p12, %p1051_p11 }
  0x43   :  { %920 = vmatprep.subr.bf16.mxu0 %v919_v36 }
  0x44   :  { %p1054_p0 = pnand %p1053_p13, %p1047_p10 }
  0x45   :  { %v965_v11 = vpop.eup %964 }
  0x46   :  { %84 = vxpose.xlu0.b32.start [1/4] (short) (narrow) %v965_v11, 32  ;;  %v967_v14 = vpop.eup %966 }
  0x47   :  { %v969_v16 = vpop.eup %968 }
  0x48   :  { %v971_v17 = vpop.eup %970 }
  0x49   :  { %v973_v27 = vpop.eup %972 }
  0x4a   :  { %85 = vxpose.xlu0.b32.cont [2/4] (short) (narrow) %v967_v14, 32  ;;  %v975_v29 = vpop.eup %974 }
  0x4b   :  { %v977_v41 = vpop.eup %976 }
  0x4c   :  { %v979_v43 = vpop.eup %978 }
  0x4e   :  { %86 = vxpose.xlu0.b32.cont [3/4] (short) (narrow) %v969_v16, 32 }
  0x52   :  { %87 = vxpose.xlu0.b32.end [4/4] (short) (narrow) %v971_v17, 32 }
  0x7b   :  { %963 = vset.pattern.permute.xlu0 %v1149_v26 }
  0x7f   :  { %284 = vadd.xlane.f32.xlu0 %v283_v54 }
  0xc6   :  { %v100_v18 = vpop.trf.xlu0 }
  0xc7   :  { %v1280_v19 = vadd.f32 %v965_v11, %v100_v18 }
  0xc9   :  { %846 = vmatprep.mubr.msk.f32.mxu0 %vm124_vm0, %v1280_v19 }
  0xca   :  { %v101_v20 = vpop.trf.xlu0 }
  0xcb   :  { %v117_v21 = vadd.f32 %v967_v14, %v101_v20 }
  0xcd   :  { %847 = vmatmul.mubr.msk.f32.vlgmr.msra.gmra.mrb[0].mxu0 %vm124_vm0, %v117_v21 }
  0xce   :  { %v102_v22 = vpop.trf.xlu0  ;;  %922 = vmatpush3.bf16.msra.mxu0 %v919_v36 }
  0xcf   :  { %v1285_v23 = vadd.f32 %v969_v16, %v102_v22  ;;  %924 = vmatprep.subr.bf16.mxu0 %v923_v40 }
  0xd1   :  { %849 = vmatprep.mubr.msk.f32.mxu0 %vm124_vm0, %v1285_v23 }
  0xd2   :  { %v103_v24 = vpop.trf.xlu0  ;;  %926 = vmatpush3.bf16.msra.mxu0 %v923_v40 }
  0xd3   :  { %v1289_v25 = vadd.f32 %v971_v17, %v103_v24  ;;  %v273_v24 = vld [vmem:[#allocation2] sm:$0xff] }
  0xd5   :  { %850 = vmatmul.mubr.msk.f32.gmra.mrb[2].mxu0 %vm124_vm0, %v1289_v25 }
 0x10c   :  { %v285_v22 = vpop.xlane.xlu0 %284 }
 0x1a0   :  { %v848_v28 = vpop.f32.mrb[0].mxu0 }
 0x1a1   :  { %v223_v30 = vsub.f32 1.0, %v848_v28  ;;  %v203_v31 = vpop.f32.mrb[1].mxu0  ;;  %v572_v28 = vld [vmem:[#allocation7 + $0x8] sm:$0xff] }
 0x1a2   :  { %v222_v32 = vsub.f32 1.0, %v203_v31  ;;  %v574_v31 = vld [vmem:[#allocation7 + $0x18] sm:$0xff] }
 0x1a3   :  { %v229_v35 = vmul.f32 %v973_v27, %v223_v30  ;;  %v571_v27 = vld [vmem:[#allocation7] sm:$0xff] }
 0x1a4   :  { %v227_v37 = vmul.f32 %v975_v29, %v222_v32  ;;  %v573_v29 = vld [vmem:[#allocation7 + $0x10] sm:$0xff]  ;;  %v935_v30 = vpack.c.bf16 %v572_v28, %v571_v27 }
 0x1a5   :  { %252 = vperm.xlu1 %962, %v229_v35   ;;  %v939_v32 = vpack.c.bf16 %v574_v31, %v573_v29 }
 0x1a6   :  { %936 = vmatprep.subr.bf16.mxu0 %v935_v30 }
 0x1a8   :  { %v851_v42 = vpop.f32.mrb[2].mxu0 }
 0x1a9   :  { %v225_v44 = vsub.f32 1.0, %v851_v42  ;;  %247 = vperm.xlu1 %962, %v227_v37   ;;  %v213_v45 = vpop.f32.mrb[3].mxu0 }
 0x1aa   :  { %v224_v46 = vsub.f32 1.0, %v213_v45 }
 0x1ab   :  { %v233_v47 = vmul.f32 %v977_v41, %v225_v44 }
 0x1ac   :  { %v231_v48 = vmul.f32 %v979_v43, %v224_v46  ;;  %v368_v46 = vsub.s32 %v1303_v58, %v1300_v56 }
 0x1ae   :  { %257 = vperm.xlu1 %962, %v231_v48  }
 0x1b2   :  { %262 = vperm.xlu1 %962, %v233_v47  }
 0x224   :  { %v253_v59 = vpop.permute.xlu1 %252 }
 0x225   :  { %v266_v60 = vsel %vm242_vm2, %v253_v59, 0.0 }
 0x226   :  { %v270_v61 = vadd.f32 %v266_v60, %v117_v21 }
 0x228   :  { %717 = vst.msk [vmem:[#allocation12 + $0x8] sm:$0xff] %vm124_vm0, %v270_v61  ;;  %v248_v63 = vpop.permute.xlu1 %247 }
 0x229   :  { %v265_v0 = vsel %vm241_vm3, %v248_v63, 0.0 }
 0x22a   :  { %v269_v1 = vadd.f32 %v265_v0, %v1280_v19 }
 0x22c   :  { %716 = vst.msk [vmem:[#allocation12] sm:$0xff] %vm124_vm0, %v269_v1  ;;  %871 = vmatprep.mubr.msk.f32.mxu0 %vm124_vm0, %v269_v1  ;;  %v914_v3 = vpack.c.bf16 %v270_v61, %v269_v1 }
 0x22d   :  { %872 = vmatmul.mubr.msk.f32.vlgmr.msra.gmra.mrb[4].mxu0 %vm124_vm0, %v270_v61  ;;  %v258_v4 = vpop.permute.xlu1 %257 }
 0x22e   :  { %v267_v5 = vsel %vm243_vm4, %v258_v4, 0.0  ;;  %915 = vmatpush3.bf16.msra.mxu1 %v914_v3  ;;  %938 = vmatpush3.bf16.msra.mxu0 %v935_v30 }
 0x22f   :  { %v271_v6 = vadd.f32 %v267_v5, %v1285_v23  ;;  %916 = vmatprep.subr.bf16.mxu1 %v1150_v49  ;;  %940 = vmatprep.subr.bf16.mxu0 %v939_v32 }
 0x231   :  { %718 = vst.msk [vmem:[#allocation12 + $0x10] sm:$0xff] %vm124_vm0, %v271_v6  ;;  %874 = vmatprep.mubr.msk.f32.mxu0 %vm124_vm0, %v271_v6  ;;  %v263_v7 = vpop.permute.xlu1 %262 }
 0x232   :  { %v268_v8 = vsel %vm244_vm5, %v263_v7, 0.0  ;;  %942 = vmatpush3.bf16.msra.mxu0 %v939_v32 }
 0x233   :  { %v272_v9 = vadd.f32 %v268_v8, %v1289_v25 }
 0x235   :  { %719 = vst.msk [vmem:[#allocation12 + $0x18] sm:$0xff] %vm124_vm0, %v272_v9  ;;  %875 = vmatmul.mubr.msk.f32.gmra.mrb[6].mxu0 %vm124_vm0, %v272_v9  ;;  %v917_v10 = vpack.c.bf16 %v272_v9, %v271_v6 }
 0x237   :  { %918 = vmatpush3.bf16.msra.mxu1 %v917_v10 }
 0x238   :  { %928 = vmatprep.subr.bf16.mxu1 %v914_v3 }
 0x23a   :  { %861 = vmatmul.mubr.msk.f32.vlgmr.msra.gmra.mrb[0].mxu1 %vm124_vm0, %v274_v51 }
 0x23b   :  { %930 = vmatpush3.bf16.msra.mxu1 %v914_v3 }
 0x23c   :  { %932 = vmatprep.subr.bf16.mxu1 %v917_v10 }
 0x23f   :  { %934 = vmatpush3.bf16.msra.mxu1 %v917_v10 }
 0x240   :  { %943 = vmatprep.subr.bf16.mxu1 %v935_v30 }
 0x300   :  { %v873_v11 = vpop.f32.mrb[4].mxu0 }
 0x301   :  { %v673_v12 = vmul.f32 2.0, %v873_v11  ;;  %v455_v13 = vpop.f32.mrb[5].mxu0  ;;  %702 = vrot.lane.b32.xlu1 %v873_v11, %s1153_s2 }
 0x302   :  { %885 = vmatprep.mubr.msk.f32.mxu1 %vm124_vm0, %v455_v13  ;;  %v672_v14 = vmul.f32 2.0, %v455_v13 }
 0x303   :  { %682 = vrot.lane.b32.xlu0 %v673_v12, %s1154_s3  ;;  %886 = vmatmul.mubr.msk.f32.vlgmr.msra.gmra.mrb[2].mxu1 %vm124_vm0, %v873_v11 }
 0x304   :  { %945 = vmatpush3.bf16.msra.mxu1 %v935_v30 }
 0x305   :  { %700 = vrot.lane.b32.xlu1 %v455_v13, %s1153_s2  ;;  %944 = vmatprep.subr.bf16.mxu1 %v939_v32 }
 0x308   :  { %v876_v15 = vpop.f32.mrb[6].mxu0  ;;  %946 = vmatpush3.bf16.msra.mxu1 %v939_v32 }
 0x309   :  { %680 = vrot.lane.b32.xlu1 %v672_v14, %s1154_s3  ;;  %v465_v16 = vpop.f32.mrb[7].mxu0  ;;  %v675_v17 = vmul.f32 2.0, %v876_v15 }
 0x30a   :  { %704 = vrot.lane.b32.xlu0 %v465_v16, %s1153_s2  ;;  %888 = vmatprep.mubr.msk.f32.mxu1 %vm124_vm0, %v465_v16  ;;  %v674_v20 = vmul.f32 2.0, %v465_v16 }
 0x30b   :  { %889 = vmatmul.mubr.msk.f32.gmra.mrb[4].mxu1 %vm124_vm0, %v876_v15 }
 0x30d   :  { %686 = vrot.lane.b32.xlu1 %v675_v17, %s1154_s3  ;;  %v355_v18 = vpop.f32.mrb[0].mxu1 }
 0x30e   :  { %v862_v19 = vpop.f32.mrb[1].mxu1  ;;  %v359_v21 = vmul.f32 0.125, %v355_v18 }
 0x310   :  { %v360_v23 = vmul.f32 %v359_v21, %v285_v22 }
 0x311   :  { %684 = vrot.lane.b32.xlu1 %v674_v20, %s1154_s3 }
 0x312   :  { %v361_v25 = vmul.f32 %v360_v23, %v273_v24 }
 0x314   :  { %v362_v26 = vsel %vm124_vm0, %v361_v25, 0.0 }
 0x335   :  { %363 = vadd.xlane.f32.xlu1 %v362_v26 }
 0x346   :  { %706 = vrot.lane.b32.xlu1 %v876_v15, %s1153_s2 }
 0x373   :  { %v703_v33 = vpop.permute.xlu1 %702 }
 0x374   :  { %713 = vst.msk [vmem:[#allocation9 + $0x8] sm:$0xff] %vm124_vm0, %v703_v33 }
 0x375   :  { %v1330_v35 = vpop.permute.xlu0 %682 }
 0x377   :  { %v701_v34 = vpop.permute.xlu1 %700 }
 0x378   :  { %712 = vst.msk [vmem:[#allocation9] sm:$0xff] %vm124_vm0, %v701_v34 }
 0x37b   :  { %v1334_v37 = vpop.permute.xlu1 %680 }
 0x37c   :  { %v705_v36 = vpop.permute.xlu0 %704 }
 0x37d   :  { %714 = vst.msk [vmem:[#allocation9 + $0x10] sm:$0xff] %vm124_vm0, %v705_v36 }
 0x37f   :  { %v1336_v38 = vpop.permute.xlu1 %686 }
 0x383   :  { %v1338_v39 = vpop.permute.xlu1 %684 }
 0x3c2   :  { %v364_v40 = vpop.xlane.xlu1 %363 }
 0x3c3   :  { %v369_v47 = vrot.slane %v364_v40, %v368_v46 }
 0x3c5   :  { %372 = vst.msk [vmem:[#allocation11] sm:$0x1] %vm371_vm6, %v369_v47 }
 0x3c6   :  { %v707_v41 = vpop.permute.xlu1 %706 }
 0x3c7   :  { %715 = vst.msk [vmem:[#allocation9 + $0x18] sm:$0xff] %vm124_vm0, %v707_v41 }
 0x3d6   :  { %v887_v42 = vpop.f32.mrb[2].mxu1 }
 0x3d7   :  { %v552_v43 = vpop.f32.mrb[3].mxu1 }
 0x3d8   :  { %899 = vmatprep.mubr.msk.f32.mxu0 %vm124_vm0, %v552_v43 }
 0x3d9   :  { %900 = vmatmul.mubr.msk.f32.vlgmr.msra.gmra.mrb[8].mxu0 %vm124_vm0, %v887_v42 }
 0x3de   :  { %v890_v44 = vpop.f32.mrb[4].mxu1 }
 0x3df   :  { %v562_v45 = vpop.f32.mrb[5].mxu1 }
 0x3e0   :  { %902 = vmatprep.mubr.msk.f32.mxu1 %vm124_vm0, %v562_v45 }
 0x3e1   :  { %903 = vmatmul.mubr.msk.f32.vlgmr.msra.gmra.mrb[6].mxu1 %vm124_vm0, %v890_v44 }
 0x3e2   :  { %1057 = shalt.err (!%p1054_p0)
}
 0x3e3   :  { %s1058_s15 = scalar_lea.hbm %s1420_s8, 512 }
 0x3e4   :  { %p1059_p1 = scmp.ne.s32.totalorder %s1420_s8, %s1058_s15  ;;  %p1062_p2 = scmp.lt.u32.totalorder %s1058_s15, %s1420_s8 }
 0x3e6   :  { %p1064_p3 = pnand %p1062_p2, %p1059_p1 }
 0x3e8   :  { %1067 = shalt.err (!%p1064_p3)
}
 0x3e9   :  { %743 = dma.vmem_to_hbm [thread:$0]  %s738_s1, 512, %s1420_s8, [#allocation10], %s1145_s23, %s1145_s23, %s1146_s24  }
 0x3ea   :  { %s1156_s14 = smov [#allocation11]   ;;  %s1157_s20 = smov [#allocation12]  }
 0x3eb   :  { %s750_s19 = sshll.u32 %s1156_s14, 4  ;;  %s759_s21 = sshll.u32 %s1157_s20, 4  ;;  %s751_s19 = int_to_ptr.vmem [resolvable:$true] %s750_s19  ;;  %s760_s21 = int_to_ptr.vmem [resolvable:$true] %s759_s21 }
 0x3ec   :  { %s1068_s22 = scalar_lea.vmem %s751_s19, 16  ;;  %s1072_s25 = scalar_lea.vmem %s751_s19, 32 }
 0x3ed   :  { %p1069_p4 = scmp.ne.s32.totalorder %s751_s19, %s1068_s22  ;;  %p1073_p5 = scmp.lt.s32.totalorder %s751_s19, %s751_s19 }
 0x3ee   :  { %p1074_p6 = scmp.lt.s32.totalorder %s1072_s25, %s1068_s22 }
 0x3f0   :  { %p1075_p7 = por %p1074_p6, %p1073_p5 }
 0x3f2   :  { %p1076_p8 = pnand %p1075_p7, %p1069_p4 }
 0x3f4   :  { %1079 = shalt.err (!%p1076_p8)
}
 0x3f5   :  { %s1080_s4 = scalar_lea.hbm %s1421_s9, 16 }
 0x3f6   :  { %p1081_p9 = scmp.ne.s32.totalorder %s1421_s9, %s1080_s4  ;;  %p1084_p10 = scmp.lt.u32.totalorder %s1080_s4, %s1421_s9 }
 0x3f8   :  { %p1086_p11 = pnand %p1084_p10, %p1081_p9 }
 0x3fa   :  { %1089 = shalt.err (!%p1086_p11)
}
 0x3fb   :  { %753 = dma.vmem_to_hbm [thread:$0]  %s751_s19, 16, %s1421_s9, [#allocation10]  }
 0x3fc   :  { %s1090_s1 = scalar_lea.vmem %s760_s21, 512  ;;  %p1095_p13 = scmp.lt.s32.totalorder %s760_s21, %s760_s21 }
 0x3fd   :  { %p1091_p12 = scmp.ne.s32.totalorder %s760_s21, %s1090_s1  ;;  %p1096_p0 = scmp.lt.s32.totalorder %s1090_s1, %s1090_s1 }
 0x3ff   :  { %p1097_p1 = por %p1096_p0, %p1095_p13 }
 0x401   :  { %p1098_p2 = pnand %p1097_p1, %p1091_p12 }
 0x403   :  { %1101 = shalt.err (!%p1098_p2)
}
 0x404   :  { %s1102_s13 = scalar_lea.hbm %s1422_s10, 512 }
 0x405   :  { %p1103_p3 = scmp.ne.s32.totalorder %s1422_s10, %s1102_s13  ;;  %p1106_p4 = scmp.lt.u32.totalorder %s1102_s13, %s1422_s10 }
 0x407   :  { %p1108_p5 = pnand %p1106_p4, %p1103_p3 }
 0x409   :  { %1111 = shalt.err (!%p1108_p5)
}
 0x40a   :  { %765 = dma.vmem_to_hbm [thread:$0]  %s760_s21, 512, %s1422_s10, [#allocation13], %s1145_s23, %s1145_s23, %s1146_s24  }
 0x40b   :  { %s1158_s6 = smov [#allocation8]  }
 0x40c   :  { %s725_s30 = sshll.u32 %s1158_s6, 4  ;;  %s726_s30 = int_to_ptr.vmem [resolvable:$true] %s725_s30 }
 0x40d   :  { %s1112_s10 = scalar_lea.vmem %s726_s30, 512  ;;  %p1117_p7 = scmp.lt.s32.totalorder %s726_s30, %s726_s30 }
 0x40e   :  { %p1113_p6 = scmp.ne.s32.totalorder %s726_s30, %s1112_s10  ;;  %p1118_p8 = scmp.lt.s32.totalorder %s1112_s10, %s1112_s10 }
 0x410   :  { %p1119_p9 = por %p1118_p8, %p1117_p7 }
 0x412   :  { %p1120_p10 = pnand %p1119_p9, %p1113_p6 }
 0x4ac   :  { %v901_v48 = vpop.f32.mrb[8].mxu0 }
 0x4ad   :  { %v693_v49 = vsub.f32 %v901_v48, %v1330_v35  ;;  %v653_v50 = vpop.f32.mrb[9].mxu0 }
 0x4ae   :  { %v692_v51 = vsub.f32 %v653_v50, %v1334_v37 }
 0x4af   :  { %697 = vst.msk [vmem:[#allocation8 + $0x8] sm:$0xff] %vm124_vm0, %v693_v49 }
 0x4b0   :  { %696 = vst.msk [vmem:[#allocation8] sm:$0xff] %vm124_vm0, %v692_v51 }
 0x4b4   :  { %v904_v52 = vpop.f32.mrb[6].mxu1 }
 0x4b5   :  { %v695_v53 = vsub.f32 %v904_v52, %v1336_v38  ;;  %v663_v54 = vpop.f32.mrb[7].mxu1 }
 0x4b6   :  { %v694_v55 = vsub.f32 %v663_v54, %v1338_v39 }
 0x4b7   :  { %699 = vst.msk [vmem:[#allocation8 + $0x18] sm:$0xff] %vm124_vm0, %v695_v53 }
 0x4b8   :  { %698 = vst.msk [vmem:[#allocation8 + $0x10] sm:$0xff] %vm124_vm0, %v694_v55 }
 0x4b9   :  { %1123 = shalt.err (!%p1120_p10)
}
 0x4ba   :  { %s1124_s20 = scalar_lea.hbm %s1419_s7, 512 }
 0x4bb   :  { %p1125_p11 = scmp.ne.s32.totalorder %s1419_s7, %s1124_s20  ;;  %p1128_p12 = scmp.lt.u32.totalorder %s1124_s20, %s1419_s7 }
 0x4bd   :  { %p1130_p13 = pnand %p1128_p12, %p1125_p11 }
 0x4bf   :  { %1133 = shalt.err (!%p1130_p13)
}
 0x4c0   :  { %731 = dma.vmem_to_hbm [thread:$0]  %s726_s30, 512, %s1419_s7, [#allocation4], %s1145_s23, %s1145_s23, %s1146_s24  }
 0x4c1   :  { %1138 = dma.done.wait [#allocation4], 512  }
 0x4c2   :  { %1139 = vsyncadd [#allocation4], 4294966784 }
 0x4c3   :  { %1140 = dma.done.wait [#allocation10], 528  }
 0x4c4   :  { %1141 = vsyncadd [#allocation10], 4294966768 }
 0x4c5   :  { %1142 = dma.done.wait [#allocation13], 512  }
 0x4c6   :  { %1143 = vsyncadd [#allocation13], 4294966784 }
 0x4c7   :  { %778 = vsyncpa [#allocation3], 1 }
 0x4c8   :  { %779 = vsyncpa [#allocation6], 1 }
 0x4c9   :  { %780 = vsyncpa [#allocation4], 1 }
 0x4ca   :  { %781 = vsyncpa [#allocation10], 1 }
 0x4cb   :  { %782 = vsyncpa [#allocation13], 1 }

</bundles_post_ra>
